<compile_context>
chip_gen: v7x
topology: tpu7x:2x2x1
jax: 0.10.0
libtpu: 0.0.40
codegen_flags: <defaults>
</compile_context>

<pallas_src>
import functools

import jax
import jax.numpy as jnp
from jax.experimental import pallas as pl
from jax.experimental.pallas import tpu as pltpu


_BLOCK_ELEMS = 2048 * 512   # ~4 MiB of f32 per block (1 Mi elements)


def _swish_kernel(x_ref, o_ref, *, beta):
    # Upcast in-register to f32 (universal: v5e has no bf16 VPU/EUP path);
    # HBM traffic stays in the input dtype.
    x = x_ref[...].astype(jnp.float32)
    # sigmoid(z) = 0.5 * tanh(0.5 * z) + 0.5  -> single EUP op per element
    # (tanh); the mul/add go to the VALU which has plenty of slack in this
    # HBM-bound kernel.  Exact (no approx-reciprocal error for large |x|).
    sig = 0.5 * jnp.tanh((0.5 * beta) * x) + 0.5
    o_ref[...] = (x * sig).astype(o_ref.dtype)


def swish(x, beta=1.12):
    """y = x * sigmoid(beta * x), elementwise, any shape/dtype."""
    orig_shape = x.shape
    dtype = x.dtype
    n = x.size
    if n == 0:
        return x

    flat = x.reshape(-1)  # contiguous reshape: free, no HBM copy

    # Pick the widest lane count that divides the element count exactly so the
    # wrapper needs no pad and no output slice (both were full-tensor copies).
    lanes = next((c for c in (512, 256, 128) if n % c == 0), None)
    padded = False
    if lanes is None:
        # TODO(synk): element counts not a multiple of 128 have no copy-free
        # lane-dense layout; fall back to a minimal pad + slice.
        lanes = 128
        total = pl.cdiv(n, lanes) * lanes
        flat = jnp.pad(flat, (0, total - n))
        padded = True

    rows = flat.size // lanes
    x2 = flat.reshape(rows, lanes)

    # ~4 MiB of f32 per block regardless of lane width; sublane-aligned rows.
    # The ragged last grid step (rows % br != 0) is handled by Pallas masking
    # instead of padding the array.
    target_rows = _BLOCK_ELEMS // lanes
    if rows <= target_rows:
        br = rows                               # single block (any row count)
    else:
        br = max(8, (target_rows // 8) * 8)     # (8, 128)-aligned tile
    grid = (pl.cdiv(rows, br),)

    itemsize = jnp.dtype(dtype).itemsize
    out = pl.pallas_call(
        functools.partial(_swish_kernel, beta=float(beta)),
        out_shape=jax.ShapeDtypeStruct((rows, lanes), dtype),
        grid=grid,
        in_specs=[pl.BlockSpec((br, lanes), lambda i: (i, 0))],
        out_specs=pl.BlockSpec((br, lanes), lambda i: (i, 0)),
        compiler_params=pltpu.CompilerParams(
            dimension_semantics=("parallel",),
            vmem_limit_bytes=32 * 1024 * 1024,
        ),
        cost_estimate=pl.CostEstimate(
            flops=3 * rows * lanes,
            transcendentals=rows * lanes,
            bytes_accessed=2 * rows * lanes * itemsize,
        ),
    )(x2)

    out_flat = out.reshape(-1)
    if padded:
        out_flat = out_flat[:n]
    return out_flat.reshape(orig_shape)


if __name__ == "__main__":
    # Small NCHW-style activation tensor, consistent with how swish is used.
    x = jax.random.normal(jax.random.PRNGKey(0), (2, 4, 16, 16), dtype=jnp.float32)

    fwd = jax.jit(swish)
    y = jax.block_until_ready(fwd(x))

    # Pure-JAX reference (matches torch: x * sigmoid(1.12 * x)).
    ref = x * jax.nn.sigmoid(1.12 * x)

    assert y.shape == x.shape, y.shape
    assert bool(jnp.all(jnp.isfinite(y)))
    max_err = float(jnp.max(jnp.abs(y - ref)))
    assert max_err < 1e-4, max_err
    print("KERNEL_OK")
</pallas_src>

<mosaic_0001>
module attributes {stable_mosaic.version = 11 : i64} {
  func.func @_swish_kernel(%arg0: i32, %arg1: memref<4x512xf32, #tpu.memory_space<vmem>>, %arg2: memref<4x512xf32, #tpu.memory_space<vmem>>) attributes {dimension_semantics = [#tpu.dimension_semantics<parallel>], iteration_bounds = array<i64: 1>, scalar_prefetch = 0 : i64, scratch_operands = 0 : i64, tpu.core_type = #tpu.core_type<tc>, window_params = [{transform_indices = @transform_0, window_bounds = array<i64: 4, 512>}, {transform_indices = @transform_1, window_bounds = array<i64: 4, 512>}]} {
    %c0 = arith.constant 0 : index
    %c0_0 = arith.constant 0 : index
    %0 = vector.load %arg1[%c0, %c0_0] : memref<4x512xf32, #tpu.memory_space<vmem>>, vector<4x512xf32>
    %cst = arith.constant 5.600000e-01 : f32
    %1 = vector.broadcast %cst : f32 to vector<4x512xf32>
    %2 = arith.mulf %1, %0 : vector<4x512xf32>
    %3 = math.tanh %2 : vector<4x512xf32>
    %cst_1 = arith.constant 5.000000e-01 : f32
    %4 = vector.broadcast %cst_1 : f32 to vector<4x512xf32>
    %5 = arith.mulf %4, %3 : vector<4x512xf32>
    %cst_2 = arith.constant 5.000000e-01 : f32
    %6 = vector.broadcast %cst_2 : f32 to vector<4x512xf32>
    %7 = arith.addf %5, %6 : vector<4x512xf32>
    %8 = arith.mulf %0, %7 : vector<4x512xf32>
    %c0_3 = arith.constant 0 : index
    %c0_4 = arith.constant 0 : index
    %9 = vector.load %arg2[%c0_3, %c0_4] : memref<4x512xf32, #tpu.memory_space<vmem>>, vector<4x512xf32>
    tpu.vector_store %arg2[%c0_3, %c0_4], %8 {strides = array<i32>} : memref<4x512xf32, #tpu.memory_space<vmem>>, vector<4x512xf32>,
    return
  }
  func.func @transform_0(%arg0: i32) -> (i32, i32) {
    %c0_i32 = arith.constant 0 : i32
    %c0_i32_0 = arith.constant 0 : i32
    return %arg0, %c0_i32 : i32, i32
  }
  func.func @transform_1(%arg0: i32) -> (i32, i32) {
    %c0_i32 = arith.constant 0 : i32
    %c0_i32_0 = arith.constant 0 : i32
    return %arg0, %c0_i32 : i32, i32
  }
}

</mosaic_0001>

<bundles_post_ra>
// kernel: swish.1
= control target key start
LH: loop header
LB: loop body
LE: loop exit
PB: predicated region body
PF: predicated region fallthrough
CT: control target
= control target key end

     0   :  { %s52_s0 = inlined_call_operand.vmem [shape: f32[4,512], index: 0, kind: input, shape index: {}]   ;;  %s53_s1 = inlined_call_operand.vmem [shape: f32[4,512], index: 1, kind: output, shape index: {}]  }
   0x1   :  { %v8_v0 = vld [vmem:[%s52_s0] sm:$0xff]  ;;  %v9_v1 = vld [vmem:[%s52_s0 + $0x8] sm:$0xff] }
   0x2   :  { %v10_v2 = vmul.f32 0.56, %v8_v0  ;;  %v11_v3 = vmul.f32 0.56, %v9_v1 }
   0x4   :  { %26 = vtanh.f32 %v10_v2 }
   0x5   :  { %28 = vtanh.f32 %v11_v3 }
   0xe   :  { %v27_v4 = vpop.eup %26 }
   0xf   :  { %v29_v5 = vpop.eup %28  ;;  %v14_v6 = vmul.f32 0.5, %v27_v4 }
  0x10   :  { %v15_v7 = vmul.f32 0.5, %v29_v5 }
  0x11   :  { %v16_v8 = vadd.f32 0.5, %v14_v6 }
  0x12   :  { %v17_v9 = vadd.f32 0.5, %v15_v7 }
  0x13   :  { %v18_v10 = vmul.f32 %v16_v8, %v8_v0 }
  0x14   :  { %v19_v11 = vmul.f32 %v17_v9, %v9_v1 }
  0x15   :  { %20 = vst [vmem:[%s53_s1] sm:$0xff] %v18_v10 }
  0x16   :  { %21 = vst [vmem:[%s53_s1 + $0x8] sm:$0xff] %v19_v11 }

</bundles_post_ra>
